<compile_context>
chip_gen: v6e
topology: v6e:2x2x1
jax: 0.10.0
libtpu: 0.0.40
codegen_flags: <defaults>
</compile_context>

<pallas_src>
import jax
import jax.numpy as jnp
from jax.experimental import pallas as pl
from jax.experimental.pallas import tpu as pltpu

D_IN, H1, H2, D_OUT = 1, 10, 5, 1
LANE = 128

# Flattened parameter layout (all offsets static Python ints).
_OFF_W1 = 0                     # w1[j, 0]        -> 10 values
_OFF_B1 = _OFF_W1 + H1          # b1[j]           -> 10 values
_OFF_W2 = _OFF_B1 + H1          # w2[k, j] at k*H1 + j -> 50 values
_OFF_B2 = _OFF_W2 + H2 * H1     # b2[k]           -> 5 values
_OFF_W3 = _OFF_B2 + H2          # w3[0, k]        -> 5 values
_OFF_B3 = _OFF_W3 + H2          # b3[0]           -> 1 value
N_PARAMS = _OFF_B3 + 1          # 81


def _mlp_kernel(p_ref, x_ref, o_ref):
    """Lane-packed VPU MLP.

    x_ref : (TB, 128) f32 tile, each element is one batch sample (D_IN == 1).
    p_ref : (81,) f32 in SMEM holding all weights/biases as scalars.
    o_ref : (TB, 128) f32 tile of logits (one per sample).
    """
    x = x_ref[...]                                                    # (TB, 128)

    # layer1: 1 -> 10   (scalar * vector + scalar, then ReLU)
    h1 = [jnp.maximum(x * p_ref[_OFF_W1 + j] + p_ref[_OFF_B1 + j], 0.0)
          for j in range(H1)]

    # layer2: 10 -> 5
    h2 = []
    for k in range(H2):
        acc = h1[0] * p_ref[_OFF_W2 + k * H1]
        for j in range(1, H1):
            acc = acc + h1[j] * p_ref[_OFF_W2 + k * H1 + j]
        h2.append(jnp.maximum(acc + p_ref[_OFF_B2 + k], 0.0))

    # output: 5 -> 1
    out = h2[0] * p_ref[_OFF_W3 + 0]
    for k in range(1, H2):
        out = out + h2[k] * p_ref[_OFF_W3 + k]
    out = out + p_ref[_OFF_B3]

    o_ref[...] = out.astype(o_ref.dtype)


def _flatten_params(params):
    w1, b1, w2, b2, w3, b3 = params   # PyTorch layout: W (out, in), b (out,)
    return jnp.concatenate([
        w1.reshape(-1).astype(jnp.float32),   # (10, 1) -> 10
        b1.reshape(-1).astype(jnp.float32),   # 10
        w2.reshape(-1).astype(jnp.float32),   # (5, 10) row-major -> 50
        b2.reshape(-1).astype(jnp.float32),   # 5
        w3.reshape(-1).astype(jnp.float32),   # (1, 5) -> 5
        b3.reshape(-1).astype(jnp.float32),   # 1
    ])


def binary_classifier_forward(x, params, *, tile_rows=512):
    """x: (batch, 1) float32  ->  (batch, 1) float32 (logits)."""
    batch = x.shape[0]
    p_flat = _flatten_params(params)                      # (81,) f32 -> SMEM

    # Pack 128 samples per lane-row.
    rows = pl.cdiv(batch, LANE)
    tb = min(tile_rows, max(8, ((rows + 7) // 8) * 8))    # sublane-aligned tile rows
    rows_p = ((rows + tb - 1) // tb) * tb
    total = rows_p * LANE

    x_flat = x.reshape(-1).astype(jnp.float32)
    if total != batch:
        x_flat = jnp.pad(x_flat, (0, total - batch))      # tiny ragged-tail pad only
    x_packed = x_flat.reshape(rows_p, LANE)

    out_packed = pl.pallas_call(
        _mlp_kernel,
        out_shape=jax.ShapeDtypeStruct((rows_p, LANE), jnp.float32),
        grid=(rows_p // tb,),
        in_specs=[
            pl.BlockSpec(memory_space=pltpu.MemorySpace.SMEM),   # scalar params
            pl.BlockSpec((tb, LANE), lambda i: (i, 0)),          # packed batch tile
        ],
        out_specs=pl.BlockSpec((tb, LANE), lambda i: (i, 0)),
        compiler_params=pltpu.CompilerParams(
            dimension_semantics=("parallel",)),
    )(p_flat, x_packed)

    return out_packed.reshape(-1)[:batch].reshape(batch, D_OUT)


def init_params(key):
    """Deterministic init matching nn.Linear shapes: W (out, in), b (out,)."""
    ks = jax.random.split(key, 6)

    def lin(kw, kb, out_f, in_f):
        bound = 1.0 / (in_f ** 0.5)
        w = jax.random.uniform(kw, (out_f, in_f), jnp.float32, -bound, bound)
        b = jax.random.uniform(kb, (out_f,), jnp.float32, -bound, bound)
        return w, b

    w1, b1 = lin(ks[0], ks[1], H1, D_IN)
    w2, b2 = lin(ks[2], ks[3], H2, H1)
    w3, b3 = lin(ks[4], ks[5], D_OUT, H2)
    return (w1, b1, w2, b2, w3, b3)


def _reference(x, params):
    w1, b1, w2, b2, w3, b3 = params
    h1 = jnp.maximum(x @ w1.T + b1, 0.0)
    h2 = jnp.maximum(h1 @ w2.T + b2, 0.0)
    return h2 @ w3.T + b3


if __name__ == "__main__":
    key = jax.random.PRNGKey(0)
    kx, kx2, kp = jax.random.split(key, 3)
    params = init_params(kp)

    # Small batch (single 8x128 tile, ragged pack).
    batch = 8
    x = jax.random.normal(kx, (batch, 1), jnp.float32)
    y = jax.block_until_ready(binary_classifier_forward(x, params))
    y_ref = _reference(x, params)
    assert y.shape == (batch, 1)
    assert jnp.allclose(y, y_ref, atol=1e-5, rtol=1e-5)

    # Batch spanning multiple packed rows with a ragged tail.
    batch2 = 300
    x2 = jax.random.normal(kx2, (batch2, 1), jnp.float32)
    y2 = jax.block_until_ready(binary_classifier_forward(x2, params))
    y2_ref = _reference(x2, params)
    assert y2.shape == (batch2, 1)
    assert jnp.allclose(y2, y2_ref, atol=1e-5, rtol=1e-5)

    print("KERNEL_OK")
</pallas_src>

<mosaic_0001>
module attributes {stable_mosaic.version = 11 : i64} {
  func.func @_mlp_kernel(%arg0: i32, %arg1: memref<81xf32, #tpu.memory_space<smem>>, %arg2: memref<8x128xf32, #tpu.memory_space<vmem>>, %arg3: memref<8x128xf32, #tpu.memory_space<vmem>>) attributes {dimension_semantics = [#tpu.dimension_semantics<parallel>], iteration_bounds = array<i64: 1>, scalar_prefetch = 0 : i64, scratch_operands = 0 : i64, tpu.core_type = #tpu.core_type<tc>, window_params = [{transform_indices = @transform_0, window_bounds = array<i64: 81>}, {transform_indices = @transform_1, window_bounds = array<i64: 8, 128>}, {transform_indices = @transform_2, window_bounds = array<i64: 8, 128>}]} {
    %c0 = arith.constant 0 : index
    %c0_0 = arith.constant 0 : index
    %0 = vector.load %arg2[%c0, %c0_0] : memref<8x128xf32, #tpu.memory_space<vmem>>, vector<8x128xf32>
    %c0_1 = arith.constant 0 : index
    %1 = memref.load %arg1[%c0_1] : memref<81xf32, #tpu.memory_space<smem>>
    %2 = vector.broadcast %1 : f32 to vector<8x128xf32>
    %3 = arith.mulf %0, %2 : vector<8x128xf32>
    %c10 = arith.constant 10 : index
    %4 = memref.load %arg1[%c10] : memref<81xf32, #tpu.memory_space<smem>>
    %5 = vector.broadcast %4 : f32 to vector<8x128xf32>
    %6 = arith.addf %3, %5 : vector<8x128xf32>
    %cst = arith.constant 0.000000e+00 : f32
    %7 = vector.broadcast %cst : f32 to vector<8x128xf32>
    %8 = arith.maximumf %6, %7 : vector<8x128xf32>
    %c1 = arith.constant 1 : index
    %9 = memref.load %arg1[%c1] : memref<81xf32, #tpu.memory_space<smem>>
    %10 = vector.broadcast %9 : f32 to vector<8x128xf32>
    %11 = arith.mulf %0, %10 : vector<8x128xf32>
    %c11 = arith.constant 11 : index
    %12 = memref.load %arg1[%c11] : memref<81xf32, #tpu.memory_space<smem>>
    %13 = vector.broadcast %12 : f32 to vector<8x128xf32>
    %14 = arith.addf %11, %13 : vector<8x128xf32>
    %cst_2 = arith.constant 0.000000e+00 : f32
    %15 = vector.broadcast %cst_2 : f32 to vector<8x128xf32>
    %16 = arith.maximumf %14, %15 : vector<8x128xf32>
    %c2 = arith.constant 2 : index
    %17 = memref.load %arg1[%c2] : memref<81xf32, #tpu.memory_space<smem>>
    %18 = vector.broadcast %17 : f32 to vector<8x128xf32>
    %19 = arith.mulf %0, %18 : vector<8x128xf32>
    %c12 = arith.constant 12 : index
    %20 = memref.load %arg1[%c12] : memref<81xf32, #tpu.memory_space<smem>>
    %21 = vector.broadcast %20 : f32 to vector<8x128xf32>
    %22 = arith.addf %19, %21 : vector<8x128xf32>
    %cst_3 = arith.constant 0.000000e+00 : f32
    %23 = vector.broadcast %cst_3 : f32 to vector<8x128xf32>
    %24 = arith.maximumf %22, %23 : vector<8x128xf32>
    %c3 = arith.constant 3 : index
    %25 = memref.load %arg1[%c3] : memref<81xf32, #tpu.memory_space<smem>>
    %26 = vector.broadcast %25 : f32 to vector<8x128xf32>
    %27 = arith.mulf %0, %26 : vector<8x128xf32>
    %c13 = arith.constant 13 : index
    %28 = memref.load %arg1[%c13] : memref<81xf32, #tpu.memory_space<smem>>
    %29 = vector.broadcast %28 : f32 to vector<8x128xf32>
    %30 = arith.addf %27, %29 : vector<8x128xf32>
    %cst_4 = arith.constant 0.000000e+00 : f32
    %31 = vector.broadcast %cst_4 : f32 to vector<8x128xf32>
    %32 = arith.maximumf %30, %31 : vector<8x128xf32>
    %c4 = arith.constant 4 : index
    %33 = memref.load %arg1[%c4] : memref<81xf32, #tpu.memory_space<smem>>
    %34 = vector.broadcast %33 : f32 to vector<8x128xf32>
    %35 = arith.mulf %0, %34 : vector<8x128xf32>
    %c14 = arith.constant 14 : index
    %36 = memref.load %arg1[%c14] : memref<81xf32, #tpu.memory_space<smem>>
    %37 = vector.broadcast %36 : f32 to vector<8x128xf32>
    %38 = arith.addf %35, %37 : vector<8x128xf32>
    %cst_5 = arith.constant 0.000000e+00 : f32
    %39 = vector.broadcast %cst_5 : f32 to vector<8x128xf32>
    %40 = arith.maximumf %38, %39 : vector<8x128xf32>
    %c5 = arith.constant 5 : index
    %41 = memref.load %arg1[%c5] : memref<81xf32, #tpu.memory_space<smem>>
    %42 = vector.broadcast %41 : f32 to vector<8x128xf32>
    %43 = arith.mulf %0, %42 : vector<8x128xf32>
    %c15 = arith.constant 15 : index
    %44 = memref.load %arg1[%c15] : memref<81xf32, #tpu.memory_space<smem>>
    %45 = vector.broadcast %44 : f32 to vector<8x128xf32>
    %46 = arith.addf %43, %45 : vector<8x128xf32>
    %cst_6 = arith.constant 0.000000e+00 : f32
    %47 = vector.broadcast %cst_6 : f32 to vector<8x128xf32>
    %48 = arith.maximumf %46, %47 : vector<8x128xf32>
    %c6 = arith.constant 6 : index
    %49 = memref.load %arg1[%c6] : memref<81xf32, #tpu.memory_space<smem>>
    %50 = vector.broadcast %49 : f32 to vector<8x128xf32>
    %51 = arith.mulf %0, %50 : vector<8x128xf32>
    %c16 = arith.constant 16 : index
    %52 = memref.load %arg1[%c16] : memref<81xf32, #tpu.memory_space<smem>>
    %53 = vector.broadcast %52 : f32 to vector<8x128xf32>
    %54 = arith.addf %51, %53 : vector<8x128xf32>
    %cst_7 = arith.constant 0.000000e+00 : f32
    %55 = vector.broadcast %cst_7 : f32 to vector<8x128xf32>
    %56 = arith.maximumf %54, %55 : vector<8x128xf32>
    %c7 = arith.constant 7 : index
    %57 = memref.load %arg1[%c7] : memref<81xf32, #tpu.memory_space<smem>>
    %58 = vector.broadcast %57 : f32 to vector<8x128xf32>
    %59 = arith.mulf %0, %58 : vector<8x128xf32>
    %c17 = arith.constant 17 : index
    %60 = memref.load %arg1[%c17] : memref<81xf32, #tpu.memory_space<smem>>
    %61 = vector.broadcast %60 : f32 to vector<8x128xf32>
    %62 = arith.addf %59, %61 : vector<8x128xf32>
    %cst_8 = arith.constant 0.000000e+00 : f32
    %63 = vector.broadcast %cst_8 : f32 to vector<8x128xf32>
    %64 = arith.maximumf %62, %63 : vector<8x128xf32>
    %c8 = arith.constant 8 : index
    %65 = memref.load %arg1[%c8] : memref<81xf32, #tpu.memory_space<smem>>
    %66 = vector.broadcast %65 : f32 to vector<8x128xf32>
    %67 = arith.mulf %0, %66 : vector<8x128xf32>
    %c18 = arith.constant 18 : index
    %68 = memref.load %arg1[%c18] : memref<81xf32, #tpu.memory_space<smem>>
    %69 = vector.broadcast %68 : f32 to vector<8x128xf32>
    %70 = arith.addf %67, %69 : vector<8x128xf32>
    %cst_9 = arith.constant 0.000000e+00 : f32
    %71 = vector.broadcast %cst_9 : f32 to vector<8x128xf32>
    %72 = arith.maximumf %70, %71 : vector<8x128xf32>
    %c9 = arith.constant 9 : index
    %73 = memref.load %arg1[%c9] : memref<81xf32, #tpu.memory_space<smem>>
    %74 = vector.broadcast %73 : f32 to vector<8x128xf32>
    %75 = arith.mulf %0, %74 : vector<8x128xf32>
    %c19 = arith.constant 19 : index
    %76 = memref.load %arg1[%c19] : memref<81xf32, #tpu.memory_space<smem>>
    %77 = vector.broadcast %76 : f32 to vector<8x128xf32>
    %78 = arith.addf %75, %77 : vector<8x128xf32>
    %cst_10 = arith.constant 0.000000e+00 : f32
    %79 = vector.broadcast %cst_10 : f32 to vector<8x128xf32>
    %80 = arith.maximumf %78, %79 : vector<8x128xf32>
    %c20 = arith.constant 20 : index
    %81 = memref.load %arg1[%c20] : memref<81xf32, #tpu.memory_space<smem>>
    %82 = vector.broadcast %81 : f32 to vector<8x128xf32>
    %83 = arith.mulf %8, %82 : vector<8x128xf32>
    %c21 = arith.constant 21 : index
    %84 = memref.load %arg1[%c21] : memref<81xf32, #tpu.memory_space<smem>>
    %85 = vector.broadcast %84 : f32 to vector<8x128xf32>
    %86 = arith.mulf %16, %85 : vector<8x128xf32>
    %87 = arith.addf %83, %86 : vector<8x128xf32>
    %c22 = arith.constant 22 : index
    %88 = memref.load %arg1[%c22] : memref<81xf32, #tpu.memory_space<smem>>
    %89 = vector.broadcast %88 : f32 to vector<8x128xf32>
    %90 = arith.mulf %24, %89 : vector<8x128xf32>
    %91 = arith.addf %87, %90 : vector<8x128xf32>
    %c23 = arith.constant 23 : index
    %92 = memref.load %arg1[%c23] : memref<81xf32, #tpu.memory_space<smem>>
    %93 = vector.broadcast %92 : f32 to vector<8x128xf32>
    %94 = arith.mulf %32, %93 : vector<8x128xf32>
    %95 = arith.addf %91, %94 : vector<8x128xf32>
    %c24 = arith.constant 24 : index
    %96 = memref.load %arg1[%c24] : memref<81xf32, #tpu.memory_space<smem>>
    %97 = vector.broadcast %96 : f32 to vector<8x128xf32>
    %98 = arith.mulf %40, %97 : vector<8x128xf32>
    %99 = arith.addf %95, %98 : vector<8x128xf32>
    %c25 = arith.constant 25 : index
    %100 = memref.load %arg1[%c25] : memref<81xf32, #tpu.memory_space<smem>>
    %101 = vector.broadcast %100 : f32 to vector<8x128xf32>
    %102 = arith.mulf %48, %101 : vector<8x128xf32>
    %103 = arith.addf %99, %102 : vector<8x128xf32>
    %c26 = arith.constant 26 : index
    %104 = memref.load %arg1[%c26] : memref<81xf32, #tpu.memory_space<smem>>
    %105 = vector.broadcast %104 : f32 to vector<8x128xf32>
    %106 = arith.mulf %56, %105 : vector<8x128xf32>
    %107 = arith.addf %103, %106 : vector<8x128xf32>
    %c27 = arith.constant 27 : index
    %108 = memref.load %arg1[%c27] : memref<81xf32, #tpu.memory_space<smem>>
    %109 = vector.broadcast %108 : f32 to vector<8x128xf32>
    %110 = arith.mulf %64, %109 : vector<8x128xf32>
    %111 = arith.addf %107, %110 : vector<8x128xf32>
    %c28 = arith.constant 28 : index
    %112 = memref.load %arg1[%c28] : memref<81xf32, #tpu.memory_space<smem>>
    %113 = vector.broadcast %112 : f32 to vector<8x128xf32>
    %114 = arith.mulf %72, %113 : vector<8x128xf32>
    %115 = arith.addf %111, %114 : vector<8x128xf32>
    %c29 = arith.constant 29 : index
    %116 = memref.load %arg1[%c29] : memref<81xf32, #tpu.memory_space<smem>>
    %117 = vector.broadcast %116 : f32 to vector<8x128xf32>
    %118 = arith.mulf %80, %117 : vector<8x128xf32>
    %119 = arith.addf %115, %118 : vector<8x128xf32>
    %c70 = arith.constant 70 : index
    %120 = memref.load %arg1[%c70] : memref<81xf32, #tpu.memory_space<smem>>
    %121 = vector.broadcast %120 : f32 to vector<8x128xf32>
    %122 = arith.addf %119, %121 : vector<8x128xf32>
    %cst_11 = arith.constant 0.000000e+00 : f32
    %123 = vector.broadcast %cst_11 : f32 to vector<8x128xf32>
    %124 = arith.maximumf %122, %123 : vector<8x128xf32>
    %c30 = arith.constant 30 : index
    %125 = memref.load %arg1[%c30] : memref<81xf32, #tpu.memory_space<smem>>
    %126 = vector.broadcast %125 : f32 to vector<8x128xf32>
    %127 = arith.mulf %8, %126 : vector<8x128xf32>
    %c31 = arith.constant 31 : index
    %128 = memref.load %arg1[%c31] : memref<81xf32, #tpu.memory_space<smem>>
    %129 = vector.broadcast %128 : f32 to vector<8x128xf32>
    %130 = arith.mulf %16, %129 : vector<8x128xf32>
    %131 = arith.addf %127, %130 : vector<8x128xf32>
    %c32 = arith.constant 32 : index
    %132 = memref.load %arg1[%c32] : memref<81xf32, #tpu.memory_space<smem>>
    %133 = vector.broadcast %132 : f32 to vector<8x128xf32>
    %134 = arith.mulf %24, %133 : vector<8x128xf32>
    %135 = arith.addf %131, %134 : vector<8x128xf32>
    %c33 = arith.constant 33 : index
    %136 = memref.load %arg1[%c33] : memref<81xf32, #tpu.memory_space<smem>>
    %137 = vector.broadcast %136 : f32 to vector<8x128xf32>
    %138 = arith.mulf %32, %137 : vector<8x128xf32>
    %139 = arith.addf %135, %138 : vector<8x128xf32>
    %c34 = arith.constant 34 : index
    %140 = memref.load %arg1[%c34] : memref<81xf32, #tpu.memory_space<smem>>
    %141 = vector.broadcast %140 : f32 to vector<8x128xf32>
    %142 = arith.mulf %40, %141 : vector<8x128xf32>
    %143 = arith.addf %139, %142 : vector<8x128xf32>
    %c35 = arith.constant 35 : index
    %144 = memref.load %arg1[%c35] : memref<81xf32, #tpu.memory_space<smem>>
    %145 = vector.broadcast %144 : f32 to vector<8x128xf32>
    %146 = arith.mulf %48, %145 : vector<8x128xf32>
    %147 = arith.addf %143, %146 : vector<8x128xf32>
    %c36 = arith.constant 36 : index
    %148 = memref.load %arg1[%c36] : memref<81xf32, #tpu.memory_space<smem>>
    %149 = vector.broadcast %148 : f32 to vector<8x128xf32>
    %150 = arith.mulf %56, %149 : vector<8x128xf32>
    %151 = arith.addf %147, %150 : vector<8x128xf32>
    %c37 = arith.constant 37 : index
    %152 = memref.load %arg1[%c37] : memref<81xf32, #tpu.memory_space<smem>>
    %153 = vector.broadcast %152 : f32 to vector<8x128xf32>
    %154 = arith.mulf %64, %153 : vector<8x128xf32>
    %155 = arith.addf %151, %154 : vector<8x128xf32>
    %c38 = arith.constant 38 : index
    %156 = memref.load %arg1[%c38] : memref<81xf32, #tpu.memory_space<smem>>
    %157 = vector.broadcast %156 : f32 to vector<8x128xf32>
    %158 = arith.mulf %72, %157 : vector<8x128xf32>
    %159 = arith.addf %155, %158 : vector<8x128xf32>
    %c39 = arith.constant 39 : index
    %160 = memref.load %arg1[%c39] : memref<81xf32, #tpu.memory_space<smem>>
    %161 = vector.broadcast %160 : f32 to vector<8x128xf32>
    %162 = arith.mulf %80, %161 : vector<8x128xf32>
    %163 = arith.addf %159, %162 : vector<8x128xf32>
    %c71 = arith.constant 71 : index
    %164 = memref.load %arg1[%c71] : memref<81xf32, #tpu.memory_space<smem>>
    %165 = vector.broadcast %164 : f32 to vector<8x128xf32>
    %166 = arith.addf %163, %165 : vector<8x128xf32>
    %cst_12 = arith.constant 0.000000e+00 : f32
    %167 = vector.broadcast %cst_12 : f32 to vector<8x128xf32>
    %168 = arith.maximumf %166, %167 : vector<8x128xf32>
    %c40 = arith.constant 40 : index
    %169 = memref.load %arg1[%c40] : memref<81xf32, #tpu.memory_space<smem>>
    %170 = vector.broadcast %169 : f32 to vector<8x128xf32>
    %171 = arith.mulf %8, %170 : vector<8x128xf32>
    %c41 = arith.constant 41 : index
    %172 = memref.load %arg1[%c41] : memref<81xf32, #tpu.memory_space<smem>>
    %173 = vector.broadcast %172 : f32 to vector<8x128xf32>
    %174 = arith.mulf %16, %173 : vector<8x128xf32>
    %175 = arith.addf %171, %174 : vector<8x128xf32>
    %c42 = arith.constant 42 : index
    %176 = memref.load %arg1[%c42] : memref<81xf32, #tpu.memory_space<smem>>
    %177 = vector.broadcast %176 : f32 to vector<8x128xf32>
    %178 = arith.mulf %24, %177 : vector<8x128xf32>
    %179 = arith.addf %175, %178 : vector<8x128xf32>
    %c43 = arith.constant 43 : index
    %180 = memref.load %arg1[%c43] : memref<81xf32, #tpu.memory_space<smem>>
    %181 = vector.broadcast %180 : f32 to vector<8x128xf32>
    %182 = arith.mulf %32, %181 : vector<8x128xf32>
    %183 = arith.addf %179, %182 : vector<8x128xf32>
    %c44 = arith.constant 44 : index
    %184 = memref.load %arg1[%c44] : memref<81xf32, #tpu.memory_space<smem>>
    %185 = vector.broadcast %184 : f32 to vector<8x128xf32>
    %186 = arith.mulf %40, %185 : vector<8x128xf32>
    %187 = arith.addf %183, %186 : vector<8x128xf32>
    %c45 = arith.constant 45 : index
    %188 = memref.load %arg1[%c45] : memref<81xf32, #tpu.memory_space<smem>>
    %189 = vector.broadcast %188 : f32 to vector<8x128xf32>
    %190 = arith.mulf %48, %189 : vector<8x128xf32>
    %191 = arith.addf %187, %190 : vector<8x128xf32>
    %c46 = arith.constant 46 : index
    %192 = memref.load %arg1[%c46] : memref<81xf32, #tpu.memory_space<smem>>
    %193 = vector.broadcast %192 : f32 to vector<8x128xf32>
    %194 = arith.mulf %56, %193 : vector<8x128xf32>
    %195 = arith.addf %191, %194 : vector<8x128xf32>
    %c47 = arith.constant 47 : index
    %196 = memref.load %arg1[%c47] : memref<81xf32, #tpu.memory_space<smem>>
    %197 = vector.broadcast %196 : f32 to vector<8x128xf32>
    %198 = arith.mulf %64, %197 : vector<8x128xf32>
    %199 = arith.addf %195, %198 : vector<8x128xf32>
    %c48 = arith.constant 48 : index
    %200 = memref.load %arg1[%c48] : memref<81xf32, #tpu.memory_space<smem>>
    %201 = vector.broadcast %200 : f32 to vector<8x128xf32>
    %202 = arith.mulf %72, %201 : vector<8x128xf32>
    %203 = arith.addf %199, %202 : vector<8x128xf32>
    %c49 = arith.constant 49 : index
    %204 = memref.load %arg1[%c49] : memref<81xf32, #tpu.memory_space<smem>>
    %205 = vector.broadcast %204 : f32 to vector<8x128xf32>
    %206 = arith.mulf %80, %205 : vector<8x128xf32>
    %207 = arith.addf %203, %206 : vector<8x128xf32>
    %c72 = arith.constant 72 : index
    %208 = memref.load %arg1[%c72] : memref<81xf32, #tpu.memory_space<smem>>
    %209 = vector.broadcast %208 : f32 to vector<8x128xf32>
    %210 = arith.addf %207, %209 : vector<8x128xf32>
    %cst_13 = arith.constant 0.000000e+00 : f32
    %211 = vector.broadcast %cst_13 : f32 to vector<8x128xf32>
    %212 = arith.maximumf %210, %211 : vector<8x128xf32>
    %c50 = arith.constant 50 : index
    %213 = memref.load %arg1[%c50] : memref<81xf32, #tpu.memory_space<smem>>
    %214 = vector.broadcast %213 : f32 to vector<8x128xf32>
    %215 = arith.mulf %8, %214 : vector<8x128xf32>
    %c51 = arith.constant 51 : index
    %216 = memref.load %arg1[%c51] : memref<81xf32, #tpu.memory_space<smem>>
    %217 = vector.broadcast %216 : f32 to vector<8x128xf32>
    %218 = arith.mulf %16, %217 : vector<8x128xf32>
    %219 = arith.addf %215, %218 : vector<8x128xf32>
    %c52 = arith.constant 52 : index
    %220 = memref.load %arg1[%c52] : memref<81xf32, #tpu.memory_space<smem>>
    %221 = vector.broadcast %220 : f32 to vector<8x128xf32>
    %222 = arith.mulf %24, %221 : vector<8x128xf32>
    %223 = arith.addf %219, %222 : vector<8x128xf32>
    %c53 = arith.constant 53 : index
    %224 = memref.load %arg1[%c53] : memref<81xf32, #tpu.memory_space<smem>>
    %225 = vector.broadcast %224 : f32 to vector<8x128xf32>
    %226 = arith.mulf %32, %225 : vector<8x128xf32>
    %227 = arith.addf %223, %226 : vector<8x128xf32>
    %c54 = arith.constant 54 : index
    %228 = memref.load %arg1[%c54] : memref<81xf32, #tpu.memory_space<smem>>
    %229 = vector.broadcast %228 : f32 to vector<8x128xf32>
    %230 = arith.mulf %40, %229 : vector<8x128xf32>
    %231 = arith.addf %227, %230 : vector<8x128xf32>
    %c55 = arith.constant 55 : index
    %232 = memref.load %arg1[%c55] : memref<81xf32, #tpu.memory_space<smem>>
    %233 = vector.broadcast %232 : f32 to vector<8x128xf32>
    %234 = arith.mulf %48, %233 : vector<8x128xf32>
    %235 = arith.addf %231, %234 : vector<8x128xf32>
    %c56 = arith.constant 56 : index
    %236 = memref.load %arg1[%c56] : memref<81xf32, #tpu.memory_space<smem>>
    %237 = vector.broadcast %236 : f32 to vector<8x128xf32>
    %238 = arith.mulf %56, %237 : vector<8x128xf32>
    %239 = arith.addf %235, %238 : vector<8x128xf32>
    %c57 = arith.constant 57 : index
    %240 = memref.load %arg1[%c57] : memref<81xf32, #tpu.memory_space<smem>>
    %241 = vector.broadcast %240 : f32 to vector<8x128xf32>
    %242 = arith.mulf %64, %241 : vector<8x128xf32>
    %243 = arith.addf %239, %242 : vector<8x128xf32>
    %c58 = arith.constant 58 : index
    %244 = memref.load %arg1[%c58] : memref<81xf32, #tpu.memory_space<smem>>
    %245 = vector.broadcast %244 : f32 to vector<8x128xf32>
    %246 = arith.mulf %72, %245 : vector<8x128xf32>
    %247 = arith.addf %243, %246 : vector<8x128xf32>
    %c59 = arith.constant 59 : index
    %248 = memref.load %arg1[%c59] : memref<81xf32, #tpu.memory_space<smem>>
    %249 = vector.broadcast %248 : f32 to vector<8x128xf32>
    %250 = arith.mulf %80, %249 : vector<8x128xf32>
    %251 = arith.addf %247, %250 : vector<8x128xf32>
    %c73 = arith.constant 73 : index
    %252 = memref.load %arg1[%c73] : memref<81xf32, #tpu.memory_space<smem>>
    %253 = vector.broadcast %252 : f32 to vector<8x128xf32>
    %254 = arith.addf %251, %253 : vector<8x128xf32>
    %cst_14 = arith.constant 0.000000e+00 : f32
    %255 = vector.broadcast %cst_14 : f32 to vector<8x128xf32>
    %256 = arith.maximumf %254, %255 : vector<8x128xf32>
    %c60 = arith.constant 60 : index
    %257 = memref.load %arg1[%c60] : memref<81xf32, #tpu.memory_space<smem>>
    %258 = vector.broadcast %257 : f32 to vector<8x128xf32>
    %259 = arith.mulf %8, %258 : vector<8x128xf32>
    %c61 = arith.constant 61 : index
    %260 = memref.load %arg1[%c61] : memref<81xf32, #tpu.memory_space<smem>>
    %261 = vector.broadcast %260 : f32 to vector<8x128xf32>
    %262 = arith.mulf %16, %261 : vector<8x128xf32>
    %263 = arith.addf %259, %262 : vector<8x128xf32>
    %c62 = arith.constant 62 : index
    %264 = memref.load %arg1[%c62] : memref<81xf32, #tpu.memory_space<smem>>
    %265 = vector.broadcast %264 : f32 to vector<8x128xf32>
    %266 = arith.mulf %24, %265 : vector<8x128xf32>
    %267 = arith.addf %263, %266 : vector<8x128xf32>
    %c63 = arith.constant 63 : index
    %268 = memref.load %arg1[%c63] : memref<81xf32, #tpu.memory_space<smem>>
    %269 = vector.broadcast %268 : f32 to vector<8x128xf32>
    %270 = arith.mulf %32, %269 : vector<8x128xf32>
    %271 = arith.addf %267, %270 : vector<8x128xf32>
    %c64 = arith.constant 64 : index
    %272 = memref.load %arg1[%c64] : memref<81xf32, #tpu.memory_space<smem>>
    %273 = vector.broadcast %272 : f32 to vector<8x128xf32>
    %274 = arith.mulf %40, %273 : vector<8x128xf32>
    %275 = arith.addf %271, %274 : vector<8x128xf32>
    %c65 = arith.constant 65 : index
    %276 = memref.load %arg1[%c65] : memref<81xf32, #tpu.memory_space<smem>>
    %277 = vector.broadcast %276 : f32 to vector<8x128xf32>
    %278 = arith.mulf %48, %277 : vector<8x128xf32>
    %279 = arith.addf %275, %278 : vector<8x128xf32>
    %c66 = arith.constant 66 : index
    %280 = memref.load %arg1[%c66] : memref<81xf32, #tpu.memory_space<smem>>
    %281 = vector.broadcast %280 : f32 to vector<8x128xf32>
    %282 = arith.mulf %56, %281 : vector<8x128xf32>
    %283 = arith.addf %279, %282 : vector<8x128xf32>
    %c67 = arith.constant 67 : index
    %284 = memref.load %arg1[%c67] : memref<81xf32, #tpu.memory_space<smem>>
    %285 = vector.broadcast %284 : f32 to vector<8x128xf32>
    %286 = arith.mulf %64, %285 : vector<8x128xf32>
    %287 = arith.addf %283, %286 : vector<8x128xf32>
    %c68 = arith.constant 68 : index
    %288 = memref.load %arg1[%c68] : memref<81xf32, #tpu.memory_space<smem>>
    %289 = vector.broadcast %288 : f32 to vector<8x128xf32>
    %290 = arith.mulf %72, %289 : vector<8x128xf32>
    %291 = arith.addf %287, %290 : vector<8x128xf32>
    %c69 = arith.constant 69 : index
    %292 = memref.load %arg1[%c69] : memref<81xf32, #tpu.memory_space<smem>>
    %293 = vector.broadcast %292 : f32 to vector<8x128xf32>
    %294 = arith.mulf %80, %293 : vector<8x128xf32>
    %295 = arith.addf %291, %294 : vector<8x128xf32>
    %c74 = arith.constant 74 : index
    %296 = memref.load %arg1[%c74] : memref<81xf32, #tpu.memory_space<smem>>
    %297 = vector.broadcast %296 : f32 to vector<8x128xf32>
    %298 = arith.addf %295, %297 : vector<8x128xf32>
    %cst_15 = arith.constant 0.000000e+00 : f32
    %299 = vector.broadcast %cst_15 : f32 to vector<8x128xf32>
    %300 = arith.maximumf %298, %299 : vector<8x128xf32>
    %c75 = arith.constant 75 : index
    %301 = memref.load %arg1[%c75] : memref<81xf32, #tpu.memory_space<smem>>
    %302 = vector.broadcast %301 : f32 to vector<8x128xf32>
    %303 = arith.mulf %124, %302 : vector<8x128xf32>
    %c76 = arith.constant 76 : index
    %304 = memref.load %arg1[%c76] : memref<81xf32, #tpu.memory_space<smem>>
    %305 = vector.broadcast %304 : f32 to vector<8x128xf32>
    %306 = arith.mulf %168, %305 : vector<8x128xf32>
    %307 = arith.addf %303, %306 : vector<8x128xf32>
    %c77 = arith.constant 77 : index
    %308 = memref.load %arg1[%c77] : memref<81xf32, #tpu.memory_space<smem>>
    %309 = vector.broadcast %308 : f32 to vector<8x128xf32>
    %310 = arith.mulf %212, %309 : vector<8x128xf32>
    %311 = arith.addf %307, %310 : vector<8x128xf32>
    %c78 = arith.constant 78 : index
    %312 = memref.load %arg1[%c78] : memref<81xf32, #tpu.memory_space<smem>>
    %313 = vector.broadcast %312 : f32 to vector<8x128xf32>
    %314 = arith.mulf %256, %313 : vector<8x128xf32>
    %315 = arith.addf %311, %314 : vector<8x128xf32>
    %c79 = arith.constant 79 : index
    %316 = memref.load %arg1[%c79] : memref<81xf32, #tpu.memory_space<smem>>
    %317 = vector.broadcast %316 : f32 to vector<8x128xf32>
    %318 = arith.mulf %300, %317 : vector<8x128xf32>
    %319 = arith.addf %315, %318 : vector<8x128xf32>
    %c80 = arith.constant 80 : index
    %320 = memref.load %arg1[%c80] : memref<81xf32, #tpu.memory_space<smem>>
    %321 = vector.broadcast %320 : f32 to vector<8x128xf32>
    %322 = arith.addf %319, %321 : vector<8x128xf32>
    %c0_16 = arith.constant 0 : index
    %c0_17 = arith.constant 0 : index
    %323 = vector.load %arg3[%c0_16, %c0_17] : memref<8x128xf32, #tpu.memory_space<vmem>>, vector<8x128xf32>
    tpu.vector_store %arg3[%c0_16, %c0_17], %322 {strides = array<i32>} : memref<8x128xf32, #tpu.memory_space<vmem>>, vector<8x128xf32>,
    return
  }
  func.func @transform_0(%arg0: i32) -> i32 {
    %c0_i32 = arith.constant 0 : i32
    %c0_i32_0 = arith.constant 0 : i32
    return %c0_i32 : i32
  }
  func.func @transform_1(%arg0: i32) -> (i32, i32) {
    %c0_i32 = arith.constant 0 : i32
    %c0_i32_0 = arith.constant 0 : i32
    return %arg0, %c0_i32 : i32, i32
  }
  func.func @transform_2(%arg0: i32) -> (i32, i32) {
    %c0_i32 = arith.constant 0 : i32
    %c0_i32_0 = arith.constant 0 : i32
    return %arg0, %c0_i32 : i32, i32
  }
}

</mosaic_0001>

<bundles_post_ra>
// kernel: tpu_custom_call.1
= control target key start
LH: loop header
LB: loop body
LE: loop exit
PB: predicated region body
PF: predicated region fallthrough
CT: control target
= control target key end

     0   :  { %7 = vsyncpa [#allocation5], 0  ;;  %s786_s0 = inlined_call_operand.hbm [shape: f32[81], index: 0, kind: input, shape index: {}]   ;;  %s787_s1 = inlined_call_operand.hbm [shape: f32[8,128], index: 1, kind: input, shape index: {}]   ;;  %s788_s2 = inlined_call_operand.hbm [shape: f32[8,128], index: 2, kind: output, shape index: {}]  }
   0x1   :  { %8 = vsyncpa [#allocation3], 0 }
   0x2   :  { %9 = vsyncpa [#allocation4], 0  ;;  %s497_s9 = smov [#allocation2]   ;;  %s498_s12 = smov [#allocation6]  }
   0x3   :  { %17 = dma.hbm_to_smem %s786_s0, 16, %s497_s9, [#allocation5]  }
   0x4   :  { %s24_s13 = sshll.u32 %s498_s12, 4  ;;  %s25_s13 = int_to_ptr.vmem [resolvable:$true] %s24_s13 }
   0x5   :  { %s459_s14 = scalar_lea.vmem %s25_s13, 128  ;;  %p464_p1 = scmp.lt.s32.totalorder %s25_s13, %s25_s13 }
   0x6   :  { %p460_p0 = scmp.ne.s32.totalorder %s25_s13, %s459_s14  ;;  %p465_p2 = scmp.lt.s32.totalorder %s459_s14, %s459_s14 }
   0x8   :  { %p466_p3 = por %p465_p2, %p464_p1 }
   0xa   :  { %p467_p4 = pnand %p466_p3, %p460_p0 }
   0xc   :  { %470 = shalt.err (!%p467_p4)
}
   0xd   :  { %27 = dma.hbm_to_vmem [thread:$0]  %s787_s1, 128, %s25_s13, [#allocation3]  }
   0xe   :  { %491 = dma.done.wait [#allocation5], 16  }
   0xf   :  { %492 = vsyncadd [#allocation5], 4294967280 }
  0x10   :  { %493 = dma.done.wait [#allocation3], 128  }
  0x11   :  { %494 = vsyncadd [#allocation3], 4294967168 }
  0x12   :  { %34 = sfence }
  0x13   :  { %s36_s0 = sld [smem:[#allocation2]]  ;;  %v543_v0 = vld [vmem:[#allocation6] sm:$0xff] }
  0x14   :  { %s360_s17 = sld [smem:[#allocation2 + $0xa]] }
  0x15   :  { %s361_s18 = sld [smem:[#allocation2 + $0x1]] }
  0x16   :  { %s362_s19 = sld [smem:[#allocation2 + $0xb]] }
  0x17   :  { %s363_s20 = sld [smem:[#allocation2 + $0x2]] }
  0x18   :  { %s521_s21 = sld [smem:[#allocation2 + $0xc]] }
  0x19   :  { %s523_s22 = sld [smem:[#allocation2 + $0x3]]  ;;  %v37_v1 = vstv %s36_s0 }
  0x1a   :  { %s525_s23 = sld [smem:[#allocation2 + $0xd]]  ;;  %v38_v3 = vmul.f32 %v37_v1, %v543_v0  ;;  %v40_v5 = vstv %s360_s17 }
  0x1b   :  { %s527_s24 = sld [smem:[#allocation2 + $0x4]]  ;;  %v44_v2 = vstv %s361_s18 }
  0x1c   :  { %s529_s25 = sld [smem:[#allocation2 + $0xe]]  ;;  %v45_v4 = vmul.f32 %v44_v2, %v543_v0  ;;  %v47_v6 = vstv %s362_s19  ;;  %v41_v8 = vadd.f32 %v40_v5, %v38_v3 }
  0x1d   :  { %s531_s1 = sld [smem:[#allocation2 + $0x5]]  ;;  %v51_v7 = vstv %s363_s20 }
  0x1e   :  { %s533_s26 = sld [smem:[#allocation2 + $0xf]]  ;;  %v48_v9 = vadd.f32 %v47_v6, %v45_v4  ;;  %v52_v10 = vmul.f32 %v51_v7, %v543_v0  ;;  %v54_v11 = vstv %s521_s21  ;;  %v569_v14 = vmax.f32 %v41_v8, 0.0 }
  0x1f   :  { %s535_s27 = sld [smem:[#allocation2 + $0x6]]  ;;  %v58_v12 = vstv %s523_s22 }
  0x20   :  { %s537_s28 = sld [smem:[#allocation2 + $0x10]]  ;;  %v571_v15 = vmax.f32 %v48_v9, 0.0  ;;  %v55_v16 = vadd.f32 %v54_v11, %v52_v10  ;;  %v59_v17 = vmul.f32 %v58_v12, %v543_v0  ;;  %v61_v18 = vstv %s525_s23 }
  0x21   :  { %s539_s29 = sld [smem:[#allocation2 + $0x7]]  ;;  %v65_v13 = vstv %s527_s24 }
  0x22   :  { %s541_s30 = sld [smem:[#allocation2 + $0x11]]  ;;  %v66_v19 = vmul.f32 %v65_v13, %v543_v0  ;;  %v68_v22 = vstv %s529_s25  ;;  %v586_v24 = vmax.f32 %v55_v16, 0.0  ;;  %v62_v25 = vadd.f32 %v61_v18, %v59_v17 }
  0x23   :  { %s545_s3 = sld [smem:[#allocation2 + $0x8]]  ;;  %v72_v23 = vstv %s531_s1 }
  0x24   :  { %s547_s4 = sld [smem:[#allocation2 + $0x12]]  ;;  %v69_v28 = vadd.f32 %v68_v22, %v66_v19  ;;  %v73_v30 = vmul.f32 %v72_v23, %v543_v0  ;;  %v75_v31 = vstv %s533_s26  ;;  %v596_v33 = vmax.f32 %v62_v25, 0.0 }
  0x25   :  { %s549_s5 = sld [smem:[#allocation2 + $0x9]]  ;;  %v79_v32 = vstv %s535_s27 }
  0x26   :  { %s553_s6 = sld [smem:[#allocation2 + $0x13]]  ;;  %v602_v37 = vmax.f32 %v69_v28, 0.0  ;;  %v76_v39 = vadd.f32 %v75_v31, %v73_v30  ;;  %v80_v40 = vmul.f32 %v79_v32, %v543_v0  ;;  %v82_v41 = vstv %s537_s28 }
  0x27   :  { %s379_s7 = sld [smem:[#allocation2 + $0x14]]  ;;  %v86_v34 = vstv %s539_s29 }
  0x28   :  { %s380_s8 = sld [smem:[#allocation2 + $0x15]]  ;;  %v87_v43 = vmul.f32 %v86_v34, %v543_v0  ;;  %v89_v44 = vstv %s541_s30  ;;  %v628_v56 = vmax.f32 %v76_v39, 0.0  ;;  %v83_v57 = vadd.f32 %v82_v41, %v80_v40 }
  0x29   :  { %s555_s9 = sld [smem:[#allocation2 + $0x16]]  ;;  %v93_v54 = vstv %s545_s3 }
  0x2a   :  { %s558_s10 = sld [smem:[#allocation2 + $0x17]]  ;;  %v90_v58 = vadd.f32 %v89_v44, %v87_v43  ;;  %v94_v1 = vmul.f32 %v93_v54, %v543_v0  ;;  %v96_v3 = vstv %s547_s4  ;;  %v643_v8 = vmax.f32 %v83_v57, 0.0 }
  0x2b   :  { %s562_s11 = sld [smem:[#allocation2 + $0x18]]  ;;  %v100_v4 = vstv %s549_s5 }
  0x2c   :  { %s565_s12 = sld [smem:[#allocation2 + $0x19]]  ;;  %v645_v9 = vmax.f32 %v90_v58, 0.0  ;;  %v97_v12 = vadd.f32 %v96_v3, %v94_v1  ;;  %v101_v13 = vmul.f32 %v100_v4, %v543_v0  ;;  %v103_v18 = vstv %s553_s6 }
  0x2d   :  { %s567_s13 = sld [smem:[#allocation2 + $0x1a]]  ;;  %v107_v20 = vstv %s379_s7 }
  0x2e   :  { %s574_s14 = sld [smem:[#allocation2 + $0x1b]]  ;;  %v110_v21 = vstv %s380_s8  ;;  %v108_v26 = vmul.f32 %v107_v20, %v569_v14  ;;  %v681_v43 = vmax.f32 %v97_v12, 0.0 }
  0x2f   :  { %s578_s15 = sld [smem:[#allocation2 + $0x1c]]  ;;  %v111_v27 = vmul.f32 %v110_v21, %v571_v15  ;;  %v114_v29 = vstv %s555_s9 }
  0x30   :  { %s581_s16 = sld [smem:[#allocation2 + $0x1d]]  ;;  %v115_v36 = vmul.f32 %v114_v29, %v586_v24  ;;  %v118_v38 = vstv %s558_s10 }
  0x31   :  { %s584_s0 = sld [smem:[#allocation2 + $0x46]]  ;;  %v112_v35 = vadd.f32 %v111_v27, %v108_v26  ;;  %v119_v48 = vmul.f32 %v118_v38, %v596_v33  ;;  %v122_v51 = vstv %s562_s11 }
  0x32   :  { %s390_s17 = sld [smem:[#allocation2 + $0x1e]]  ;;  %v123_v61 = vmul.f32 %v122_v51, %v602_v37  ;;  %v126_v2 = vstv %s565_s12 }
  0x33   :  { %s391_s18 = sld [smem:[#allocation2 + $0x1f]]  ;;  %v116_v47 = vadd.f32 %v115_v36, %v112_v35  ;;  %v127_v11 = vmul.f32 %v126_v2, %v628_v56  ;;  %v130_v16 = vstv %s567_s13  ;;  %v104_v35 = vadd.f32 %v103_v18, %v101_v13 }
  0x34   :  { %s392_s19 = sld [smem:[#allocation2 + $0x20]]  ;;  %v131_v27 = vmul.f32 %v130_v16, %v643_v8  ;;  %v134_v30 = vstv %s574_s14 }
  0x35   :  { %s594_s20 = sld [smem:[#allocation2 + $0x21]]  ;;  %v120_v60 = vadd.f32 %v119_v48, %v116_v47  ;;  %v138_v47 = vstv %s578_s15 }
  0x36   :  { %s600_s21 = sld [smem:[#allocation2 + $0x22]] }
  0x37   :  { %s605_s22 = sld [smem:[#allocation2 + $0x23]]  ;;  %v124_v10 = vadd.f32 %v123_v61, %v120_v60  ;;  %v142_v60 = vstv %s581_s16 }
  0x38   :  { %v150_v42 = vstv %s390_s17  ;;  %s609_s23 = sld [smem:[#allocation2 + $0x24]] }
  0x39   :  { %v151_v45 = vmul.f32 %v150_v42, %v569_v14  ;;  %v153_v46 = vstv %s391_s18  ;;  %s614_s24 = sld [smem:[#allocation2 + $0x25]]  ;;  %v128_v26 = vadd.f32 %v127_v11, %v124_v10 }
  0x3a   :  { %v154_v49 = vmul.f32 %v153_v46, %v571_v15  ;;  %v157_v50 = vstv %s392_s19  ;;  %s618_s25 = sld [smem:[#allocation2 + $0x26]] }
  0x3b   :  { %v158_v52 = vmul.f32 %v157_v50, %v586_v24  ;;  %v161_v53 = vstv %s594_s20  ;;  %s623_s1 = sld [smem:[#allocation2 + $0x27]]  ;;  %v132_v44 = vadd.f32 %v131_v27, %v128_v26  ;;  %v691_v50 = vmax.f32 %v104_v35, 0.0 }
  0x3c   :  { %v155_v55 = vadd.f32 %v154_v49, %v151_v45  ;;  %s626_s26 = sld [smem:[#allocation2 + $0x47]]  ;;  %v162_v59 = vmul.f32 %v161_v53, %v596_v33  ;;  %v165_v63 = vstv %s600_s21  ;;  %v135_v45 = vmul.f32 %v134_v30, %v645_v9 }
  0x3d   :  { %s401_s27 = sld [smem:[#allocation2 + $0x28]]  ;;  %v166_v6 = vmul.f32 %v165_v63, %v602_v37  ;;  %v169_v7 = vstv %s605_s22 }
  0x3e   :  { %v159_v62 = vadd.f32 %v158_v52, %v155_v55  ;;  %s402_s28 = sld [smem:[#allocation2 + $0x29]]  ;;  %v170_v19 = vmul.f32 %v169_v7, %v628_v56  ;;  %v173_v23 = vstv %s609_s23  ;;  %v136_v58 = vadd.f32 %v135_v45, %v132_v44 }
  0x3f   :  { %s403_s29 = sld [smem:[#allocation2 + $0x2a]]  ;;  %v174_v36 = vmul.f32 %v173_v23, %v643_v8  ;;  %v177_v40 = vstv %s614_s24 }
  0x40   :  { %s637_s30 = sld [smem:[#allocation2 + $0x2b]]  ;;  %v163_v5 = vadd.f32 %v162_v59, %v159_v62  ;;  %v178_v51 = vmul.f32 %v177_v40, %v645_v9  ;;  %v181_v54 = vstv %s618_s25  ;;  %v139_v59 = vmul.f32 %v138_v47, %v681_v43 }
  0x41   :  { %s641_s3 = sld [smem:[#allocation2 + $0x2c]]  ;;  %v182_v3 = vmul.f32 %v181_v54, %v681_v43  ;;  %v185_v13 = vstv %s623_s1 }
  0x42   :  { %s648_s7 = sld [smem:[#allocation2 + $0x2d]]  ;;  %v167_v22 = vadd.f32 %v166_v6, %v163_v5  ;;  %v140_v23 = vadd.f32 %v139_v59, %v136_v58 }
  0x43   :  { %v193_v17 = vstv %s401_s27  ;;  %s652_s4 = sld [smem:[#allocation2 + $0x2e]] }
  0x44   :  { %v194_v20 = vmul.f32 %v193_v17, %v569_v14  ;;  %v196_v21 = vstv %s402_s28  ;;  %s657_s5 = sld [smem:[#allocation2 + $0x2f]]  ;;  %v171_v39 = vadd.f32 %v170_v19, %v167_v22  ;;  %v143_v19 = vmul.f32 %v142_v60, %v691_v50 }
  0x45   :  { %v197_v0 = vmul.f32 %v196_v21, %v571_v15  ;;  %v200_v25 = vstv %s403_s29  ;;  %s661_s8 = sld [smem:[#allocation2 + $0x30]] }
  0x46   :  { %v201_v28 = vmul.f32 %v200_v25, %v586_v24  ;;  %v204_v29 = vstv %s637_s30  ;;  %s666_s6 = sld [smem:[#allocation2 + $0x31]]  ;;  %v175_v53 = vadd.f32 %v174_v36, %v171_v39  ;;  %v189_v39 = vstv %s626_s26 }
  0x47   :  { %v198_v31 = vadd.f32 %v197_v0, %v194_v20  ;;  %v205_v32 = vmul.f32 %v204_v29, %v596_v33  ;;  %v208_v34 = vstv %s641_s3  ;;  %s671_s9 = sld [smem:[#allocation2 + $0x48]] }
  0x48   :  { %v212_v38 = vstv %s648_s7  ;;  %s675_s10 = sld [smem:[#allocation2 + $0x32]]  ;;  %v209_v42 = vmul.f32 %v208_v34, %v602_v37  ;;  %v179_v7 = vadd.f32 %v178_v51, %v175_v53 }
  0x49   :  { %v202_v41 = vadd.f32 %v201_v28, %v198_v31  ;;  %s679_s11 = sld [smem:[#allocation2 + $0x33]]  ;;  %v216_v46 = vstv %s652_s4  ;;  %v213_v49 = vmul.f32 %v212_v38, %v628_v56  ;;  %v186_v28 = vmul.f32 %v185_v13, %v691_v50 }
  0x4a   :  { %s685_s12 = sld [smem:[#allocation2 + $0x34]]  ;;  %v220_v52 = vstv %s657_s5  ;;  %v217_v57 = vmul.f32 %v216_v46, %v643_v8  ;;  %v183_v27 = vadd.f32 %v182_v3, %v179_v7  ;;  %v144_v38 = vadd.f32 %v143_v19, %v140_v23 }
  0x4b   :  { %v206_v48 = vadd.f32 %v205_v32, %v202_v41  ;;  %s689_s13 = sld [smem:[#allocation2 + $0x35]]  ;;  %v221_v63 = vmul.f32 %v220_v52, %v645_v9  ;;  %v224_v4 = vstv %s661_s8  ;;  %v146_v32 = vstv %s584_s0 }
  0x4c   :  { %s695_s14 = sld [smem:[#allocation2 + $0x36]]  ;;  %v225_v21 = vmul.f32 %v224_v4, %v681_v43  ;;  %v228_v0 = vstv %s666_s6  ;;  %s499_s6 = smov [#allocation7]  }
  0x4d   :  { %v210_v55 = vadd.f32 %v209_v42, %v206_v48  ;;  %s699_s15 = sld [smem:[#allocation2 + $0x37]]  ;;  %v229_v35 = vmul.f32 %v228_v0, %v691_v50  ;;  %v187_v42 = vadd.f32 %v186_v28, %v183_v27  ;;  %v232_v44 = vstv %s671_s9  ;;  %s350_s9 = sshll.u32 %s499_s6, 4  ;;  %s351_s9 = int_to_ptr.vmem [resolvable:$true] %s350_s9 }
  0x4e   :  { %v236_v61 = vstv %s675_s10  ;;  %s704_s17 = sld [smem:[#allocation2 + $0x38]]  ;;  %s471_s10 = scalar_lea.vmem %s351_s9, 128 }
  0x4f   :  { %v214_v62 = vadd.f32 %v213_v49, %v210_v55  ;;  %v237_v1 = vmul.f32 %v236_v61, %v569_v14  ;;  %v239_v2 = vstv %s679_s11  ;;  %s709_s18 = sld [smem:[#allocation2 + $0x39]]  ;;  %p472_p5 = scmp.ne.s32.totalorder %s351_s9, %s471_s10 }
  0x50   :  { %v240_v5 = vmul.f32 %v239_v2, %v571_v15  ;;  %v243_v6 = vstv %s685_s12  ;;  %s715_s16 = sld [smem:[#allocation2 + $0x3a]]  ;;  %p476_p6 = scmp.lt.s32.totalorder %s351_s9, %s351_s9 }
  0x51   :  { %v218_v10 = vadd.f32 %v217_v57, %v214_v62  ;;  %v244_v11 = vmul.f32 %v243_v6, %v586_v24  ;;  %v247_v12 = vstv %s689_s13  ;;  %s719_s19 = sld [smem:[#allocation2 + $0x3b]]  ;;  %p477_p7 = scmp.lt.s32.totalorder %s471_s10, %s471_s10 }
  0x52   :  { %v241_v16 = vadd.f32 %v240_v5, %v237_v1  ;;  %v248_v17 = vmul.f32 %v247_v12, %v596_v33  ;;  %v251_v18 = vstv %s695_s14  ;;  %s724_s20 = sld [smem:[#allocation2 + $0x49]]  ;;  %v190_v1 = vadd.f32 %v189_v39, %v187_v42 }
  0x53   :  { %v222_v20 = vadd.f32 %v221_v63, %v218_v10  ;;  %v255_v22 = vstv %s699_s15  ;;  %s423_s21 = sld [smem:[#allocation2 + $0x3c]]  ;;  %v252_v26 = vmul.f32 %v251_v18, %v602_v37  ;;  %p478_p8 = por %p477_p7, %p476_p6 }
  0x54   :  { %v245_v25 = vadd.f32 %v244_v11, %v241_v16  ;;  %s731_s22 = sld [smem:[#allocation2 + $0x3d]]  ;;  %v259_v29 = vstv %s704_s17  ;;  %v256_v31 = vmul.f32 %v255_v22, %v628_v56  ;;  %v191_v13 = vmax.f32 %v190_v1, 0.0 }
  0x55   :  { %s735_s23 = sld [smem:[#allocation2 + $0x3e]]  ;;  %v226_v34 = vadd.f32 %v225_v21, %v222_v20  ;;  %v263_v36 = vstv %s709_s18  ;;  %v260_v41 = vmul.f32 %v259_v29, %v643_v8  ;;  %p479_p9 = pnand %p478_p8, %p472_p5 }
  0x56   :  { %v249_v30 = vadd.f32 %v248_v17, %v245_v25  ;;  %s738_s24 = sld [smem:[#allocation2 + $0x3f]]  ;;  %v267_v45 = vstv %s715_s16  ;;  %v264_v48 = vmul.f32 %v263_v36, %v645_v9 }
  0x57   :  { %s743_s25 = sld [smem:[#allocation2 + $0x40]]  ;;  %v230_v52 = vadd.f32 %v229_v35, %v226_v34  ;;  %v271_v53 = vstv %s719_s19  ;;  %v268_v58 = vmul.f32 %v267_v45, %v681_v43 }
  0x58   :  { %v253_v40 = vadd.f32 %v252_v26, %v249_v30  ;;  %s747_s1 = sld [smem:[#allocation2 + $0x41]]  ;;  %v272_v2 = vmul.f32 %v271_v53, %v691_v50  ;;  %v275_v17 = vstv %s724_s20 }
  0x59   :  { %v279_v46 = vstv %s423_s21  ;;  %s751_s0 = sld [smem:[#allocation2 + $0x42]]  ;;  %v233_v4 = vadd.f32 %v232_v44, %v230_v52 }
  0x5a   :  { %v257_v47 = vadd.f32 %v256_v31, %v253_v40  ;;  %v280_v49 = vmul.f32 %v279_v46, %v569_v14  ;;  %v282_v51 = vstv %s731_s22  ;;  %s756_s26 = sld [smem:[#allocation2 + $0x43]]  ;;  %v147_v14 = vadd.f32 %v146_v32, %v144_v38 }
  0x5b   :  { %v283_v54 = vmul.f32 %v282_v51, %v571_v15  ;;  %v286_v55 = vstv %s735_s23  ;;  %s761_s27 = sld [smem:[#allocation2 + $0x44]]  ;;  %v234_v18 = vmax.f32 %v233_v4, 0.0 }
  0x5c   :  { %v261_v57 = vadd.f32 %v260_v41, %v257_v47  ;;  %v287_v59 = vmul.f32 %v286_v55, %v586_v24  ;;  %v290_v60 = vstv %s738_s24  ;;  %s766_s28 = sld [smem:[#allocation2 + $0x45]] }
  0x5d   :  { %v284_v61 = vadd.f32 %v283_v54, %v280_v49  ;;  %v291_v62 = vmul.f32 %v290_v60, %v596_v33  ;;  %v294_v63 = vstv %s743_s25  ;;  %s434_s29 = sld [smem:[#allocation2 + $0x4b]]  ;;  %v148_v33 = vmax.f32 %v147_v14, 0.0 }
  0x5e   :  { %v265_v15 = vadd.f32 %v264_v48, %v261_v57  ;;  %v298_v3 = vstv %s747_s1  ;;  %v295_v24 = vmul.f32 %v294_v63, %v602_v37  ;;  %s435_s30 = sld [smem:[#allocation2 + $0x4c]] }
  0x5f   :  { %v288_v5 = vadd.f32 %v287_v59, %v284_v61  ;;  %v302_v7 = vstv %s751_s0  ;;  %s436_s3 = sld [smem:[#allocation2 + $0x4d]]  ;;  %v299_v11 = vmul.f32 %v298_v3, %v628_v56 }
  0x60   :  { %v269_v6 = vadd.f32 %v268_v58, %v265_v15  ;;  %v306_v12 = vstv %s756_s26  ;;  %s437_s7 = sld [smem:[#allocation2 + $0x4e]]  ;;  %v303_v20 = vmul.f32 %v302_v7, %v643_v8 }
  0x61   :  { %v292_v10 = vadd.f32 %v291_v62, %v288_v5  ;;  %v307_v37 = vmul.f32 %v306_v12, %v645_v9  ;;  %v310_v21 = vstv %s761_s27  ;;  %s433_s4 = sld [smem:[#allocation2 + $0x4a]] }
  0x62   :  { %v273_v16 = vadd.f32 %v272_v2, %v269_v6  ;;  %v314_v22 = vstv %s766_s28  ;;  %v311_v30 = vmul.f32 %v310_v21, %v681_v43  ;;  %s438_s5 = sld [smem:[#allocation2 + $0x4f]] }
  0x63   :  { %v296_v19 = vadd.f32 %v295_v24, %v292_v10  ;;  %v322_v23 = vstv %s434_s29  ;;  %v315_v31 = vmul.f32 %v314_v22, %v691_v50  ;;  %s439_s8 = sld [smem:[#allocation2 + $0x50]] }
  0x64   :  { %v276_v0 = vadd.f32 %v275_v17, %v273_v16  ;;  %v323_v26 = vmul.f32 %v322_v23, %v148_v33  ;;  %v325_v27 = vstv %s435_s30 }
  0x65   :  { %v300_v25 = vadd.f32 %v299_v11, %v296_v19  ;;  %v326_v56 = vmul.f32 %v325_v27, %v191_v13  ;;  %v329_v28 = vstv %s436_s3 }
  0x66   :  { %v277_v32 = vmax.f32 %v276_v0, 0.0  ;;  %v330_v9 = vmul.f32 %v329_v28, %v234_v18  ;;  %v333_v35 = vstv %s437_s7 }
  0x67   :  { %v304_v29 = vadd.f32 %v303_v20, %v300_v25  ;;  %v327_v34 = vadd.f32 %v326_v56, %v323_v26  ;;  %v318_v38 = vstv %s433_s4 }
  0x68   :  { %v334_v41 = vmul.f32 %v333_v35, %v277_v32  ;;  %v337_v44 = vstv %s438_s5 }
  0x69   :  { %v308_v8 = vadd.f32 %v307_v37, %v304_v29  ;;  %v331_v40 = vadd.f32 %v330_v9, %v327_v34  ;;  %v341_v43 = vstv %s439_s8 }
  0x6b   :  { %v312_v36 = vadd.f32 %v311_v30, %v308_v8  ;;  %v335_v46 = vadd.f32 %v334_v41, %v331_v40 }
  0x6d   :  { %v316_v39 = vadd.f32 %v315_v31, %v312_v36 }
  0x6f   :  { %v319_v42 = vadd.f32 %v318_v38, %v316_v39 }
  0x71   :  { %v320_v45 = vmax.f32 %v319_v42, 0.0 }
  0x73   :  { %v338_v47 = vmul.f32 %v337_v44, %v320_v45 }
  0x75   :  { %v339_v50 = vadd.f32 %v338_v47, %v335_v46 }
  0x77   :  { %v342_v48 = vadd.f32 %v341_v43, %v339_v50 }
  0x79   :  { %343 = vst [vmem:[#allocation7] sm:$0xff] %v342_v48 }
  0x7a   :  { %482 = shalt.err (!%p479_p9)
}
  0x7b   :  { %353 = dma.vmem_to_hbm [thread:$0]  %s351_s9, 128, %s788_s2, [#allocation4]  }
  0x7c   :  { %495 = dma.done.wait [#allocation4], 128  }
  0x7d   :  { %496 = vsyncadd [#allocation4], 4294967168 }
  0x7e   :  { %357 = vsyncpa [#allocation3], 1 }
  0x7f   :  { %358 = vsyncpa [#allocation4], 1 }
  0x80   :  { %359 = vsyncpa [#allocation5], 1 }

</bundles_post_ra>
